<compile_context>
chip_gen: v6e
topology: v6e:2x2x1
jax: 0.10.0
libtpu: 0.0.40
codegen_flags: <defaults>
</compile_context>

<pallas_src>
import math
import functools

import jax
import jax.numpy as jnp
from jax.experimental import pallas as pl
from jax.experimental.pallas import tpu as pltpu


# --------------------------- generation-aware VMEM ---------------------------
def _vmem_limit_bytes():
    """~75% of physical VMEM, clamped to [32 MiB, 100 MiB].

    v5e / v6e (128 MiB physical) -> 96 MiB;  v7x (64 MiB per TC) -> 48 MiB.
    """
    cap = 128 * 1024 * 1024
    try:
        cap = int(pltpu.get_tpu_info().vmem_capacity_bytes)
    except Exception:
        pass
    return int(min(max(cap * 3 // 4, 32 * 1024 * 1024), 100 * 1024 * 1024))


_VMEM_LIMIT = _vmem_limit_bytes()


def _pick_tile(dim, target, granule):
    """Largest tile <= target (multiple of `granule`) that divides `dim` exactly.

    Exact divisibility is required on reduction axes (matmul K, attention KV)
    so padded tail blocks never leak garbage into the accumulation.
    """
    if dim <= target:
        return dim
    if dim % target == 0:
        return target
    start = (target // granule) * granule
    for cand in range(start, 0, -granule):
        if dim % cand == 0:
            return cand
    return dim


# ----------------------- tiled linear:  y = x @ w + b -----------------------
def _linear_kernel(x_ref, w_ref, b_ref, o_ref, acc_ref):
    k = pl.program_id(2)

    @pl.when(k == 0)
    def _init():
        acc_ref[...] = jnp.zeros_like(acc_ref)

    acc_ref[...] += jnp.dot(x_ref[...], w_ref[...],
                            preferred_element_type=jnp.float32)

    @pl.when(k == pl.num_programs(2) - 1)
    def _finalize():
        o_ref[...] = (acc_ref[...] + b_ref[...].astype(jnp.float32)).astype(o_ref.dtype)


def pallas_linear(x, w, b, *, tm=512, tn=512, tk=512):
    """x: [M, Din], w: [Din, Dout], b: [1, Dout] -> [M, Dout]."""
    M, Din = x.shape
    Dout = w.shape[1]
    tm = min(M, tm)            # tail of M only pollutes discarded output rows
    tn = min(Dout, tn)         # tail of N only pollutes discarded output cols
    tk = _pick_tile(Din, tk, 128)  # reduction axis: must divide Din exactly
    grid = (pl.cdiv(M, tm), pl.cdiv(Dout, tn), Din // tk)

    itemsize = jnp.dtype(x.dtype).itemsize
    cost = pl.CostEstimate(
        flops=2 * M * Din * Dout,
        transcendentals=0,
        bytes_accessed=(M * Din + Din * Dout + M * Dout + Dout) * itemsize,
    )

    return pl.pallas_call(
        _linear_kernel,
        out_shape=jax.ShapeDtypeStruct((M, Dout), x.dtype),
        grid_spec=pltpu.PrefetchScalarGridSpec(
            num_scalar_prefetch=0,
            grid=grid,
            in_specs=[
                pl.BlockSpec((tm, tk), lambda i, j, k: (i, k)),
                pl.BlockSpec((tk, tn), lambda i, j, k: (k, j)),
                pl.BlockSpec((1, tn), lambda i, j, k: (0, j)),
            ],
            out_specs=pl.BlockSpec((tm, tn), lambda i, j, k: (i, j)),
            scratch_shapes=[pltpu.VMEM((tm, tn), jnp.float32)],
        ),
        compiler_params=pltpu.CompilerParams(
            dimension_semantics=("parallel", "parallel", "arbitrary"),
            vmem_limit_bytes=_VMEM_LIMIT,
        ),
        cost_estimate=cost,
    )(x, w, b)


# ----------------------------- attention kernel -----------------------------
# Natural layout (no head transposes):
#   q: [B, L, H*E], k: [B, S, H*E], v: [B, S, H*D] -> out: [B, L, H*D]
# Flash-style online softmax over KV blocks; heads indexed inside the kernel;
# a single lane-dense (tq, H*D) store per output tile.
def _attention_kernel(q_ref, k_ref, v_ref, o_ref, m_ref, l_ref, acc_ref,
                      *, scale, H, E, D, mm_dtype):
    ki = pl.program_id(2)

    @pl.when(ki == 0)
    def _init():
        m_ref[...] = jnp.full(m_ref.shape, -jnp.inf, m_ref.dtype)
        l_ref[...] = jnp.zeros_like(l_ref)
        acc_ref[...] = jnp.zeros_like(acc_ref)

    q = q_ref[0]   # (tq,  H*E)
    k = k_ref[0]   # (tkv, H*E)
    v = v_ref[0]   # (tkv, H*D)

    for h in range(H):
        eh = slice(h * E, (h + 1) * E)
        dh = slice(h * D, (h + 1) * D)

        # Scale folded into the small (tq, E) Q slice instead of (tq, tkv) scores.
        qh = (q[:, eh] * scale).astype(mm_dtype)
        kh = k[:, eh].astype(mm_dtype)
        vh = v[:, dh].astype(mm_dtype)

        # (tq, tkv) scores; contraction over E, no materialized K^T, f32 accumulate.
        s = jax.lax.dot_general(qh, kh, (((1,), (1,)), ((), ())),
                                preferred_element_type=jnp.float32)

        m_prev = m_ref[h]                                  # (tq, 1)
        m_cur = jnp.max(s, axis=-1, keepdims=True)
        m_new = jnp.maximum(m_prev, m_cur)
        alpha = jnp.exp(m_prev - m_new)                    # (tq, 1)
        p = jnp.exp(s - m_new)                             # (tq, tkv) f32

        l_ref[h] = alpha * l_ref[h] + jnp.sum(p, axis=-1, keepdims=True)
        m_ref[h] = m_new

        pv = jax.lax.dot_general(p.astype(mm_dtype), vh, (((1,), (0,)), ((), ())),
                                 preferred_element_type=jnp.float32)  # (tq, D)
        acc_ref[:, dh] = alpha * acc_ref[:, dh] + pv

    @pl.when(ki == pl.num_programs(2) - 1)
    def _finalize():
        for h in range(H):
            dh = slice(h * D, (h + 1) * D)
            inv = pl.reciprocal(l_ref[h], approx=True)     # EUP slot, ~free
            acc_ref[:, dh] = acc_ref[:, dh] * inv
        # Single lane-dense (tq, H*D) store -> unmasked vst.
        o_ref[0] = acc_ref[...].astype(o_ref.dtype)


def pallas_full_attention(q, k, v, scale, *, n_heads, tq=256, tkv=512,
                          matmul_bf16=True):
    """q: [B, L, H*E], k: [B, S, H*E], v: [B, S, H*D] -> [B, L, H*D]."""
    B, L, HE = q.shape
    _, S, HD = v.shape
    H = n_heads
    E = HE // H
    D = HD // H

    tq = min(L, tq)                 # query tail blocks are safe (rows discarded)
    tkv = _pick_tile(S, tkv, 8)     # KV reduction axis: must divide S exactly

    # bf16 MXU operands (f32 accumulation) when inputs are f32; near-2x MXU win
    # on v6e/v7x, well inside the layer's tolerance.
    mm_dtype = jnp.bfloat16 if (matmul_bf16 and q.dtype == jnp.float32) else q.dtype

    kernel = functools.partial(_attention_kernel, scale=scale, H=H, E=E, D=D,
                               mm_dtype=mm_dtype)

    itemsize = jnp.dtype(q.dtype).itemsize
    cost = pl.CostEstimate(
        flops=2 * B * H * L * S * (E + D),
        transcendentals=B * H * L * S,
        bytes_accessed=(q.size + k.size + v.size + B * L * HD) * itemsize,
    )

    # Default tiles (tq=256, tkv=512) keep the double-buffered footprint under
    # ~10 MiB for H*E, H*D up to ~1024, so they fit v7x's 48 MiB limit too.
    return pl.pallas_call(
        kernel,
        out_shape=jax.ShapeDtypeStruct((B, L, HD), q.dtype),
        grid_spec=pltpu.PrefetchScalarGridSpec(
            num_scalar_prefetch=0,
            grid=(B, pl.cdiv(L, tq), S // tkv),
            in_specs=[
                pl.BlockSpec((1, tq, HE), lambda b, qi, ki: (b, qi, 0)),
                pl.BlockSpec((1, tkv, HE), lambda b, qi, ki: (b, ki, 0)),
                pl.BlockSpec((1, tkv, HD), lambda b, qi, ki: (b, ki, 0)),
            ],
            out_specs=pl.BlockSpec((1, tq, HD), lambda b, qi, ki: (b, qi, 0)),
            scratch_shapes=[
                pltpu.VMEM((H, tq, 1), jnp.float32),   # running max  m
                pltpu.VMEM((H, tq, 1), jnp.float32),   # running sum  l
                pltpu.VMEM((tq, HD), jnp.float32),     # output accumulator
            ],
        ),
        compiler_params=pltpu.CompilerParams(
            dimension_semantics=("parallel", "parallel", "arbitrary"),
            vmem_limit_bytes=_VMEM_LIMIT,
        ),
        cost_estimate=cost,
    )(q, k, v)


# ------------------------------ AttentionLayer ------------------------------
def init_attention_layer_params(key, d_model, n_heads, d_keys=None, d_values=None,
                                dtype=jnp.float32):
    d_keys = d_keys or d_model // n_heads
    d_values = d_values or d_model // n_heads
    ks = jax.random.split(key, 8)

    def lin(kw, kb, din, dout):
        bound = 1.0 / math.sqrt(din)  # PyTorch nn.Linear default init range
        w = jax.random.uniform(kw, (din, dout), dtype, -bound, bound)
        b = jax.random.uniform(kb, (1, dout), dtype, -bound, bound)
        return w, b

    w_q, b_q = lin(ks[0], ks[1], d_model, d_keys * n_heads)
    w_k, b_k = lin(ks[2], ks[3], d_model, d_keys * n_heads)
    w_v, b_v = lin(ks[4], ks[5], d_model, d_values * n_heads)
    w_o, b_o = lin(ks[6], ks[7], d_values * n_heads, d_model)

    # Pre-concatenated fused weights (avoids re-materializing them each forward).
    w_qkv = jnp.concatenate([w_q, w_k, w_v], axis=1)
    b_qkv = jnp.concatenate([b_q, b_k, b_v], axis=1)
    w_kv = jnp.concatenate([w_k, w_v], axis=1)
    b_kv = jnp.concatenate([b_k, b_v], axis=1)

    return dict(n_heads=n_heads, w_q=w_q, b_q=b_q, w_k=w_k, b_k=b_k,
                w_v=w_v, b_v=b_v, w_o=w_o, b_o=b_o,
                w_qkv=w_qkv, b_qkv=b_qkv, w_kv=w_kv, b_kv=b_kv)


def attention_layer_forward(params, queries, keys, values, attn_mask=None):
    # TODO(synk): attn_mask / causal masking and attention dropout are not applied;
    # inner attention is FullAttention(mask_flag=False, dropout=0, output_attention=False).
    B, L, _ = queries.shape
    _, S, _ = keys.shape
    H = params["n_heads"]
    d_qk = params["w_q"].shape[1]   # H * d_keys
    d_v = params["w_v"].shape[1]    # H * d_values

    q2d = queries.reshape(B * L, -1)
    k2d = keys.reshape(B * S, -1)
    v2d = values.reshape(B * S, -1)

    if (queries is keys) and (keys is values):
        # Self-attention: one fused QKV matmul -> activations read from HBM once.
        qkv = pallas_linear(q2d, params["w_qkv"], params["b_qkv"])
        q, k, v = qkv[:, :d_qk], qkv[:, d_qk:2 * d_qk], qkv[:, 2 * d_qk:]
    elif keys is values:
        q = pallas_linear(q2d, params["w_q"], params["b_q"])
        kv = pallas_linear(k2d, params["w_kv"], params["b_kv"])
        k, v = kv[:, :d_qk], kv[:, d_qk:]
    else:
        q = pallas_linear(q2d, params["w_q"], params["b_q"])
        k = pallas_linear(k2d, params["w_k"], params["b_k"])
        v = pallas_linear(v2d, params["w_v"], params["b_v"])

    E = d_qk // H
    scale = 1.0 / math.sqrt(E)

    # Natural layout: no [B,H,L,E] transposes; heads are split inside the kernel
    # and the attention output comes back lane-dense as [B, L, H*D].
    qh = q.reshape(B, L, d_qk)
    kh = k.reshape(B, S, d_qk)
    vh = v.reshape(B, S, d_v)

    oh = pallas_full_attention(qh, kh, vh, scale, n_heads=H)   # [B, L, H*D]
    out2d = oh.reshape(B * L, d_v)

    out = pallas_linear(out2d, params["w_o"], params["b_o"]).reshape(B, L, -1)
    return out, None


# -------------------------------- reference ---------------------------------
def _reference(params, queries, keys, values):
    B, L, _ = queries.shape
    _, S, _ = keys.shape
    H = params["n_heads"]
    q = (queries @ params["w_q"] + params["b_q"]).reshape(B, L, H, -1)
    k = (keys @ params["w_k"] + params["b_k"]).reshape(B, S, H, -1)
    v = (values @ params["w_v"] + params["b_v"]).reshape(B, S, H, -1)
    E = q.shape[-1]
    scale = 1.0 / math.sqrt(E)
    scores = jnp.einsum("blhe,bshe->bhls", q, k) * scale
    a = jax.nn.softmax(scores, axis=-1)
    o = jnp.einsum("bhls,bshd->blhd", a, v).reshape(B, L, -1)
    return o @ params["w_o"] + params["b_o"]


if __name__ == "__main__":
    B, L, S = 2, 8, 8
    d_model, n_heads = 32, 4

    key = jax.random.PRNGKey(0)
    kp, kq, kk, kv = jax.random.split(key, 4)

    params = init_attention_layer_params(kp, d_model, n_heads)

    # Case 1: self-attention (exercises the fused QKV projection path).
    x = jax.random.normal(kq, (B, L, d_model), jnp.float32)
    out_sa, attn = attention_layer_forward(params, x, x, x, attn_mask=None)
    out_sa = jax.block_until_ready(out_sa)
    ref_sa = _reference(params, x, x, x)
    assert out_sa.shape == (B, L, d_model)
    assert attn is None
    # Tolerance accounts for bf16 MXU operands + approximate (EUP) reciprocal.
    assert jnp.allclose(out_sa, ref_sa, atol=3e-2, rtol=3e-2), \
        float(jnp.max(jnp.abs(out_sa - ref_sa)))

    # Case 2: cross-attention (separate projection path).
    queries = jax.random.normal(kq, (B, L, d_model), jnp.float32)
    keys = jax.random.normal(kk, (B, S, d_model), jnp.float32)
    values = jax.random.normal(kv, (B, S, d_model), jnp.float32)
    out_ca, _ = attention_layer_forward(params, queries, keys, values, attn_mask=None)
    out_ca = jax.block_until_ready(out_ca)
    ref_ca = _reference(params, queries, keys, values)
    assert out_ca.shape == (B, L, d_model)
    assert jnp.allclose(out_ca, ref_ca, atol=3e-2, rtol=3e-2), \
        float(jnp.max(jnp.abs(out_ca - ref_ca)))

    print("KERNEL_OK")
</pallas_src>

<mosaic_0001>
module attributes {stable_mosaic.version = 11 : i64} {
  func.func @_linear_kernel(%arg0: i32, %arg1: i32, %arg2: i32, %arg3: memref<16x32xf32, #tpu.memory_space<vmem>>, %arg4: memref<32x96xf32, #tpu.memory_space<vmem>>, %arg5: memref<1x96xf32, #tpu.memory_space<vmem>>, %arg6: memref<16x96xf32, #tpu.memory_space<vmem>>, %arg7: memref<16x96xf32, #tpu.memory_space<vmem>>) attributes {dimension_semantics = [#tpu.dimension_semantics<parallel>, #tpu.dimension_semantics<parallel>, #tpu.dimension_semantics<arbitrary>], iteration_bounds = array<i64: 1, 1, 1>, scalar_prefetch = 0 : i64, scratch_operands = 1 : i64, tpu.core_type = #tpu.core_type<tc>, window_params = [{transform_indices = @transform_0, window_bounds = array<i64: 16, 32>}, {transform_indices = @transform_1, window_bounds = array<i64: 32, 96>}, {transform_indices = @transform_2, window_bounds = array<i64: 1, 96>}, {transform_indices = @transform_3, window_bounds = array<i64: 16, 96>}]} {
    %c0_i32 = arith.constant 0 : i32
    %0 = arith.cmpi eq, %arg2, %c0_i32 : i32
    %1 = arith.extui %0 : i1 to i32
    %c0_i32_0 = arith.constant 0 : i32
    %2 = arith.cmpi ne, %1, %c0_i32_0 : i32
    scf.if %2 {
      %cst_10 = arith.constant 0.000000e+00 : f32
      %12 = vector.broadcast %cst_10 : f32 to vector<16x96xf32>
      %c0_11 = arith.constant 0 : index
      %c0_12 = arith.constant 0 : index
      %13 = vector.load %arg7[%c0_11, %c0_12] : memref<16x96xf32, #tpu.memory_space<vmem>>, vector<16x96xf32>
      tpu.vector_store %arg7[%c0_11, %c0_12], %12 {strides = array<i32>} : memref<16x96xf32, #tpu.memory_space<vmem>>, vector<16x96xf32>,
    } else {
    }
    %c0 = arith.constant 0 : index
    %c0_1 = arith.constant 0 : index
    %3 = vector.load %arg7[%c0, %c0_1] : memref<16x96xf32, #tpu.memory_space<vmem>>, vector<16x96xf32>
    %c0_2 = arith.constant 0 : index
    %c0_3 = arith.constant 0 : index
    %4 = vector.load %arg3[%c0_2, %c0_3] : memref<16x32xf32, #tpu.memory_space<vmem>>, vector<16x32xf32>
    %c0_4 = arith.constant 0 : index
    %c0_5 = arith.constant 0 : index
    %5 = vector.load %arg4[%c0_4, %c0_5] : memref<32x96xf32, #tpu.memory_space<vmem>>, vector<32x96xf32>
    %cst = arith.constant dense<0.000000e+00> : vector<16x96xf32>
    %6 = tpu.matmul %4, %5, %cst {dimension_numbers = #tpu.dot_dimension_numbers<[1], [0], [0], [1], [0, 0, 1, 1], [], []>} : vector<16x32xf32>, vector<32x96xf32>, vector<16x96xf32> -> vector<16x96xf32>
    %7 = arith.addf %3, %6 : vector<16x96xf32>
    %c0_6 = arith.constant 0 : index
    %c0_7 = arith.constant 0 : index
    %8 = vector.load %arg7[%c0_6, %c0_7] : memref<16x96xf32, #tpu.memory_space<vmem>>, vector<16x96xf32>
    tpu.vector_store %arg7[%c0_6, %c0_7], %7 {strides = array<i32>} : memref<16x96xf32, #tpu.memory_space<vmem>>, vector<16x96xf32>,
    %c0_i32_8 = arith.constant 0 : i32
    %9 = arith.cmpi eq, %arg2, %c0_i32_8 : i32
    %10 = arith.extui %9 : i1 to i32
    %c0_i32_9 = arith.constant 0 : i32
    %11 = arith.cmpi ne, %10, %c0_i32_9 : i32
    scf.if %11 {
      %c0_10 = arith.constant 0 : index
      %c0_11 = arith.constant 0 : index
      %12 = vector.load %arg7[%c0_10, %c0_11] : memref<16x96xf32, #tpu.memory_space<vmem>>, vector<16x96xf32>
      %c0_12 = arith.constant 0 : index
      %c0_13 = arith.constant 0 : index
      %13 = vector.load %arg5[%c0_12, %c0_13] : memref<1x96xf32, #tpu.memory_space<vmem>>, vector<1x96xf32>
      %14 = vector.broadcast %13 : vector<1x96xf32> to vector<16x96xf32>
      %15 = arith.addf %12, %14 : vector<16x96xf32>
      %c0_14 = arith.constant 0 : index
      %c0_15 = arith.constant 0 : index
      %16 = vector.load %arg6[%c0_14, %c0_15] : memref<16x96xf32, #tpu.memory_space<vmem>>, vector<16x96xf32>
      tpu.vector_store %arg6[%c0_14, %c0_15], %15 {strides = array<i32>} : memref<16x96xf32, #tpu.memory_space<vmem>>, vector<16x96xf32>,
    } else {
    }
    return
  }
  func.func @transform_0(%arg0: i32, %arg1: i32, %arg2: i32) -> (i32, i32) {
    %c0_i32 = arith.constant 0 : i32
    return %arg0, %arg2 : i32, i32
  }
  func.func @transform_1(%arg0: i32, %arg1: i32, %arg2: i32) -> (i32, i32) {
    %c0_i32 = arith.constant 0 : i32
    return %arg2, %arg1 : i32, i32
  }
  func.func @transform_2(%arg0: i32, %arg1: i32, %arg2: i32) -> (i32, i32) {
    %c0_i32 = arith.constant 0 : i32
    %c0_i32_0 = arith.constant 0 : i32
    return %c0_i32, %arg1 : i32, i32
  }
  func.func @transform_3(%arg0: i32, %arg1: i32, %arg2: i32) -> (i32, i32) {
    %c0_i32 = arith.constant 0 : i32
    return %arg0, %arg1 : i32, i32
  }
}

</mosaic_0001>

<bundles_post_ra>
// kernel: tpu_custom_call.1
= control target key start
LH: loop header
LB: loop body
LE: loop exit
PB: predicated region body
PF: predicated region fallthrough
CT: control target
= control target key end

     0   :  { %8 = vsyncpa [#allocation4], 0  ;;  %s326_s0 = inlined_call_operand.hbm [shape: f32[16,32], index: 0, kind: input, shape index: {}]   ;;  %s327_s1 = inlined_call_operand.hbm [shape: f32[32,96], index: 1, kind: input, shape index: {}]   ;;  %s328_s2 = inlined_call_operand.vmem [shape: f32[1,96], index: 2, kind: input, shape index: {}]   ;;  %s329_s3 = inlined_call_operand.hbm [shape: f32[16,96], index: 3, kind: output, shape index: {}]  }
   0x1   :  { %9 = vsyncpa [#allocation7], 0 }
   0x2   :  { %10 = vsyncpa [#allocation5], 0  ;;  %s271_s12 = smov [#allocation3]  }
   0x3   :  { %s16_s13 = sshll.u32 %s271_s12, 4  ;;  %s17_s13 = int_to_ptr.vmem [resolvable:$true] %s16_s13 }
   0x4   :  { %s213_s14 = scalar_lea.vmem %s17_s13, 256  ;;  %p218_p1 = scmp.lt.s32.totalorder %s17_s13, %s17_s13 }
   0x5   :  { %p214_p0 = scmp.ne.s32.totalorder %s17_s13, %s213_s14  ;;  %p219_p2 = scmp.lt.s32.totalorder %s213_s14, %s213_s14 }
   0x7   :  { %p220_p3 = por %p219_p2, %p218_p1 }
   0x9   :  { %p221_p4 = pnand %p220_p3, %p214_p0 }
   0xb   :  { %224 = shalt.err (!%p221_p4)
}
   0xc   :  { %s272_s15 = smov 128   ;;  %s273_s16 = smov 8  }
   0xd   :  { %22 = dma.hbm_to_vmem [thread:$0]  %s326_s0, 256, %s17_s13, [#allocation4], %s272_s15, %s272_s15, %s273_s16  }
   0xe   :  { %s274_s19 = smov [#allocation6]  }
   0xf   :  { %s28_s20 = sshll.u32 %s274_s19, 4  ;;  %s29_s20 = int_to_ptr.vmem [resolvable:$true] %s28_s20 }
  0x10   :  { %s233_s21 = scalar_lea.vmem %s29_s20, 512  ;;  %p238_p6 = scmp.lt.s32.totalorder %s29_s20, %s29_s20 }
  0x11   :  { %p234_p5 = scmp.ne.s32.totalorder %s29_s20, %s233_s21  ;;  %p239_p7 = scmp.lt.s32.totalorder %s233_s21, %s233_s21 }
  0x13   :  { %p240_p8 = por %p239_p7, %p238_p6 }
  0x15   :  { %p241_p9 = pnand %p240_p8, %p234_p5 }
  0x17   :  { %244 = shalt.err (!%p241_p9)
}
  0x18   :  { %34 = dma.hbm_to_vmem [thread:$0]  %s327_s1, 512, %s29_s20, [#allocation7], %s272_s15, %s272_s15, %s273_s16  }
  0x19   :  { %265 = dma.done.wait [#allocation4], 256  }
  0x1a   :  { %266 = vsyncadd [#allocation4], 4294967040 }
  0x1b   :  { %267 = dma.done.wait [#allocation7], 512  }
  0x1c   :  { %268 = vsyncadd [#allocation7], 4294966784  ;;  %vm47_vm0 = vcmask 785408   ;;  %v275_v0 = vmov 0.0   ;;  %vm58_vm1 = vcmask 261120   ;;  %v57_v1 = vld [vmem:[#allocation6 + $0x18] sm:$0xff] }
  0x1d   :  { %49 = vst.msk [vmem:[#allocation2 + $0x8] sm:$0xff] %vm47_vm0, %v275_v0  ;;  %48 = vst.msk [vmem:[#allocation2] sm:$0xff] %vm47_vm0, %v275_v0  ;;  %v56_v2 = vld [vmem:[#allocation6 + $0x10] sm:$0xff]  ;;  %188 = vmatprep.subr.mxu0 %v57_v1  ;;  %v55_v4 = vld [vmem:[#allocation6 + $0x8] sm:$0xff]  ;;  %s276_s24 = smov [#allocation8]  }
  0x1e   :  { %v52_v3 = vld [vmem:[#allocation3] sm:$0xff]  ;;  %189 = vmatpush3.msra.mxu0 %v57_v1  ;;  %v54_v5 = vld [vmem:[#allocation6] sm:$0xff]  ;;  %v53_v6 = vld [vmem:[#allocation3 + $0x8] sm:$0xff]  ;;  %s166_s25 = sshll.u32 %s276_s24, 4  ;;  %s167_s25 = int_to_ptr.vmem [resolvable:$true] %s166_s25 }
  0x1f   :  { %196 = vmatprep.mubr.msk.f32.mxu0 %vm58_vm1, %v52_v3  ;;  %190 = vmatprep.subr.mxu0 %v56_v2  ;;  %v181_v13 = vld [vmem:[%s328_s2] ss:$0 sm:$0xff]  ;;  %s245_s26 = scalar_lea.vmem %s167_s25, 256  ;;  %p250_p11 = scmp.lt.s32.totalorder %s167_s25, %s167_s25 }
  0x20   :  { %191 = vmatpush3.msra.mxu0 %v56_v2  ;;  %p246_p10 = scmp.ne.s32.totalorder %s167_s25, %s245_s26  ;;  %p251_p12 = scmp.lt.s32.totalorder %s245_s26, %s245_s26 }
  0x21   :  { %192 = vmatprep.subr.mxu0 %v55_v4 }
  0x22   :  { %193 = vmatpush3.msra.mxu0 %v55_v4  ;;  %p252_p13 = por %p251_p12, %p250_p11 }
  0x23   :  { %194 = vmatprep.subr.mxu0 %v54_v5 }
  0x24   :  { %195 = vmatpush3.msra.mxu0 %v54_v5  ;;  %v51_v7 = vld [vmem:[#allocation2 + $0x8] sm:$0xff]  ;;  %v50_v9 = vld [vmem:[#allocation2] sm:$0xff]  ;;  %p253_p0 = pnand %p252_p13, %p246_p10 }
  0x25   :  { %197 = vmatmul.mubr.msk.f32.vlgmr.msra.gmra.mxu0 %vm58_vm1, %v53_v6 }
  0xe5   :  { %v198_v8 = vpop.f32.mrf.mxu0 }
  0xe6   :  { %v141_v10 = vadd.f32 %v198_v8, %v51_v7 }
  0xe7   :  { %v131_v11 = vpop.f32.mrf.mxu0 }
  0xe8   :  { %144 = vst.msk [vmem:[#allocation2 + $0x8] sm:$0xff] %vm47_vm0, %v141_v10  ;;  %v140_v12 = vadd.f32 %v131_v11, %v50_v9 }
  0xea   :  { %143 = vst.msk [vmem:[#allocation2] sm:$0xff] %vm47_vm0, %v140_v12 }
  0xef   :  { %v149_v14 = vld [vmem:[#allocation2 + $0x8] sm:$0xff] }
  0xf0   :  { %v158_v15 = vadd.f32 %v181_v13, %v149_v14 }
  0xf1   :  { %v148_v16 = vld [vmem:[#allocation2] sm:$0xff] }
  0xf2   :  { %v157_v17 = vadd.f32 %v181_v13, %v148_v16  ;;  %160 = vst.msk [vmem:[#allocation8 + $0x8] sm:$0xff] %vm47_vm0, %v158_v15 }
  0xf4   :  { %159 = vst.msk [vmem:[#allocation8] sm:$0xff] %vm47_vm0, %v157_v17 }
  0xf5   :  { %256 = shalt.err (!%p253_p0)
}
  0xf6   :  { %172 = dma.vmem_to_hbm [thread:$0]  %s167_s25, 256, %s329_s3, [#allocation5], %s272_s15, %s272_s15, %s273_s16  }
  0xf7   :  { %269 = dma.done.wait [#allocation5], 256  }
  0xf8   :  { %270 = vsyncadd [#allocation5], 4294967040 }
  0xf9   :  { %176 = vsyncpa [#allocation4], 1 }
  0xfa   :  { %177 = vsyncpa [#allocation7], 1 }
  0xfb   :  { %178 = vsyncpa [#allocation5], 1 }

</bundles_post_ra>
